<compile_context>
chip_gen: v7x
topology: tpu7x:2x2x1
jax: 0.10.0
libtpu: 0.0.40
codegen_flags: <defaults>
</compile_context>

<pallas_src>
import math

import jax
import jax.numpy as jnp
from jax.experimental import pallas as pl
from jax.experimental.pallas import tpu as pltpu

IN_FEATURES = 28 * 28      # 784 (kept unpadded — equals full array dim, legal block)
HIDDEN = 32
NUM_CLASSES = 10
OUT_PADDED = 128           # lane-dense output block (classes 0..9 valid)
_NEG_BIG = -1e30           # logit sentinel for padded class lanes


def _round_up(n, m):
    return ((n + m - 1) // m) * m


def _cdiv(a, b):
    return -(-a // b)


def fcn_kernel(x_ref, w1_ref, b1_ref, w2_ref, b2_ref, w3_ref, b3_ref,
               w4_ref, b4_ref, o_ref):
    # Layer 1: Linear(784->32) + ReLU. Cast x to bf16 in-kernel (VPU slot is
    # free; keeps the HBM read at the native dtype), f32 accumulation on MXU.
    x = x_ref[...].astype(jnp.bfloat16)
    h = jnp.dot(x, w1_ref[...], preferred_element_type=jnp.float32)
    h = jnp.maximum(h + b1_ref[...], 0.0)
    # TODO(synk): nn.Dropout() treated as identity (inference / eval semantics).

    # Layer 2: Linear(32->32) + ReLU
    h = jnp.dot(h.astype(jnp.bfloat16), w2_ref[...],
                preferred_element_type=jnp.float32)
    h = jnp.maximum(h + b2_ref[...], 0.0)

    # Layer 3: Linear(32->32) + ReLU
    h = jnp.dot(h.astype(jnp.bfloat16), w3_ref[...],
                preferred_element_type=jnp.float32)
    h = jnp.maximum(h + b3_ref[...], 0.0)

    # Output layer: Linear(32->10) padded to 128 lanes. Padded lanes have
    # bias = -1e30 so they never win the max and their exp underflows to 0.
    logits = jnp.dot(h.astype(jnp.bfloat16), w4_ref[...],
                     preferred_element_type=jnp.float32) + b4_ref[...]

    # Numerically-stable log_softmax over the class axis (f32 math).
    m = jnp.max(logits, axis=-1, keepdims=True)
    shifted = logits - m
    lse = jnp.log(jnp.sum(jnp.exp(shifted), axis=-1, keepdims=True))
    o_ref[...] = (shifted - lse).astype(o_ref.dtype)   # bf16 writeback


def fcn_forward(x, params, *, tile_b_max=2048):
    """x: (B, 1, 28, 28) or anything flattenable to (-1, 784)."""
    x2d = x.reshape(-1, IN_FEATURES)
    if x2d.dtype not in (jnp.float32, jnp.bfloat16):
        x2d = x2d.astype(jnp.float32)
    B = x2d.shape[0]

    # --- Tile picking ---------------------------------------------------
    # Keep batch padding small (<=15 rows/tile) and keep the grid even (and
    # >=2 once the batch is big enough) so a 2-TensorCore part (v7x) can
    # shard the "parallel" batch axis instead of idling a core.
    n_tiles = max(1, _cdiv(B, tile_b_max))
    if n_tiles == 1 and B >= 32:
        n_tiles = 2
    elif n_tiles > 1 and n_tiles % 2 == 1:
        n_tiles += 1
    tile_b = _round_up(_cdiv(B, n_tiles), 16)   # 16: bf16 output sublane pack
    b_pad = n_tiles * tile_b

    if b_pad != B:
        x2d = jnp.pad(x2d, ((0, b_pad - B), (0, 0)))

    # Weights -> bf16 for the MXU (tiny, DMA'd once); biases stay f32.
    w1 = params["w1"].astype(jnp.bfloat16)                       # (784, 32)
    w2 = params["w2"].astype(jnp.bfloat16)                       # (32, 32)
    w3 = params["w3"].astype(jnp.bfloat16)                       # (32, 32)
    w4 = jnp.pad(params["w4"],
                 ((0, 0), (0, OUT_PADDED - NUM_CLASSES))).astype(jnp.bfloat16)
    b1, b2, b3 = params["b1"], params["b2"], params["b3"]
    b4 = jnp.pad(params["b4"], ((0, 0), (0, OUT_PADDED - NUM_CLASSES)),
                 constant_values=_NEG_BIG)

    def pinned(arr):  # weights/biases: same block every grid step (VMEM-resident)
        return pl.BlockSpec(arr.shape, lambda i: (0, 0))

    grid_spec = pltpu.PrefetchScalarGridSpec(
        num_scalar_prefetch=0,
        grid=(n_tiles,),
        in_specs=[
            # x tile: last dim 784 == full array dim (legal, no lane padding).
            pl.BlockSpec((tile_b, IN_FEATURES), lambda i: (i, 0)),
            pinned(w1), pinned(b1),
            pinned(w2), pinned(b2),
            pinned(w3), pinned(b3),
            pinned(w4), pinned(b4),
        ],
        out_specs=pl.BlockSpec((tile_b, OUT_PADDED), lambda i: (i, 0)),
    )

    flops = 2 * b_pad * (IN_FEATURES * HIDDEN
                         + 2 * HIDDEN * HIDDEN
                         + HIDDEN * OUT_PADDED)
    bytes_accessed = (b_pad * IN_FEATURES * x2d.dtype.itemsize
                      + (w1.size + w2.size + w3.size + w4.size) * 2
                      + (b1.size + b2.size + b3.size + b4.size) * 4
                      + b_pad * OUT_PADDED * 2)
    transcendentals = b_pad * (OUT_PADDED + 1)   # exp per lane + log per row

    out = pl.pallas_call(
        fcn_kernel,
        out_shape=jax.ShapeDtypeStruct((b_pad, OUT_PADDED), jnp.bfloat16),
        grid_spec=grid_spec,
        compiler_params=pltpu.CompilerParams(
            dimension_semantics=("parallel",),
            vmem_limit_bytes=48 * 1024 * 1024,
        ),
        cost_estimate=pl.CostEstimate(
            flops=int(flops),
            bytes_accessed=int(bytes_accessed),
            transcendentals=int(transcendentals),
        ),
    )(x2d, w1, b1, w2, b2, w3, b3, w4, b4)

    # Drop batch padding and padded class lanes; return f32 log-probs.
    return out[:B, :NUM_CLASSES].astype(jnp.float32)


def init_params(key):
    """PyTorch nn.Linear default init: U(-1/sqrt(fan_in), 1/sqrt(fan_in)).
    Weights stored transposed vs. PyTorch, i.e. (in_features, out_features)."""
    dims = [(IN_FEATURES, HIDDEN), (HIDDEN, HIDDEN),
            (HIDDEN, HIDDEN), (HIDDEN, NUM_CLASSES)]
    params = {}
    for idx, (fan_in, fan_out) in enumerate(dims, start=1):
        key, kw, kb = jax.random.split(key, 3)
        bound = 1.0 / math.sqrt(fan_in)
        params[f"w{idx}"] = jax.random.uniform(
            kw, (fan_in, fan_out), jnp.float32, minval=-bound, maxval=bound)
        params[f"b{idx}"] = jax.random.uniform(
            kb, (1, fan_out), jnp.float32, minval=-bound, maxval=bound)
    return params


def fcn_reference(x, params):
    """Plain-JAX reference using the same bf16-in / f32-accumulate recipe."""
    h = x.reshape(-1, IN_FEATURES).astype(jnp.float32)

    def lin(a, w, b):
        return jnp.dot(a.astype(jnp.bfloat16), w.astype(jnp.bfloat16),
                       preferred_element_type=jnp.float32) + b

    h = jnp.maximum(lin(h, params["w1"], params["b1"]), 0.0)
    h = jnp.maximum(lin(h, params["w2"], params["b2"]), 0.0)
    h = jnp.maximum(lin(h, params["w3"], params["b3"]), 0.0)
    logits = lin(h, params["w4"], params["b4"])
    return jax.nn.log_softmax(logits, axis=1)


if __name__ == "__main__":
    key = jax.random.PRNGKey(0)
    key, kx = jax.random.split(key)

    # Small MNIST-like batch: NCHW (B=8, C=1, H=28, W=28)
    x = jax.random.normal(kx, (8, 1, 28, 28), jnp.float32)
    params = init_params(key)

    out = fcn_forward(x, params)
    out = jax.block_until_ready(out)

    ref = fcn_reference(x, params)
    assert out.shape == (8, NUM_CLASSES)
    # bf16 matmul inputs + bf16 output writeback -> widened tolerance.
    assert jnp.allclose(out, ref, atol=2e-2, rtol=2e-2)
    # Rows of log_softmax should exp-sum to ~1 over the 10 valid classes
    # (tolerance covers bf16 rounding of the stored log-probs).
    assert jnp.allclose(jnp.sum(jnp.exp(out), axis=1), 1.0, atol=1e-2)

    print("KERNEL_OK")
</pallas_src>

<mosaic_0001>
module attributes {stable_mosaic.version = 11 : i64} {
  func.func @fcn_kernel(%arg0: i32, %arg1: memref<16x784xf32, #tpu.memory_space<vmem>>, %arg2: memref<784x32xbf16, #tpu.memory_space<vmem>>, %arg3: memref<1x32xf32, #tpu.memory_space<vmem>>, %arg4: memref<32x32xbf16, #tpu.memory_space<vmem>>, %arg5: memref<1x32xf32, #tpu.memory_space<vmem>>, %arg6: memref<32x32xbf16, #tpu.memory_space<vmem>>, %arg7: memref<1x32xf32, #tpu.memory_space<vmem>>, %arg8: memref<32x128xbf16, #tpu.memory_space<vmem>>, %arg9: memref<1x128xf32, #tpu.memory_space<vmem>>, %arg10: memref<16x128xbf16, #tpu.memory_space<vmem>>) attributes {dimension_semantics = [#tpu.dimension_semantics<parallel>], iteration_bounds = array<i64: 1>, scalar_prefetch = 0 : i64, scratch_operands = 0 : i64, tpu.core_type = #tpu.core_type<tc>, window_params = [{transform_indices = @transform_0, window_bounds = array<i64: 16, 784>}, {pipeline_mode = #tpu.pipeline_mode<synchronous>, transform_indices = @transform_1, window_bounds = array<i64: 784, 32>}, {pipeline_mode = #tpu.pipeline_mode<synchronous>, transform_indices = @transform_2, window_bounds = array<i64: 1, 32>}, {pipeline_mode = #tpu.pipeline_mode<synchronous>, transform_indices = @transform_3, window_bounds = array<i64: 32, 32>}, {pipeline_mode = #tpu.pipeline_mode<synchronous>, transform_indices = @transform_4, window_bounds = array<i64: 1, 32>}, {pipeline_mode = #tpu.pipeline_mode<synchronous>, transform_indices = @transform_5, window_bounds = array<i64: 32, 32>}, {pipeline_mode = #tpu.pipeline_mode<synchronous>, transform_indices = @transform_6, window_bounds = array<i64: 1, 32>}, {pipeline_mode = #tpu.pipeline_mode<synchronous>, transform_indices = @transform_7, window_bounds = array<i64: 32, 128>}, {pipeline_mode = #tpu.pipeline_mode<synchronous>, transform_indices = @transform_8, window_bounds = array<i64: 1, 128>}, {transform_indices = @transform_9, window_bounds = array<i64: 16, 128>}]} {
    %c0 = arith.constant 0 : index
    %c0_0 = arith.constant 0 : index
    %0 = vector.load %arg1[%c0, %c0_0] : memref<16x784xf32, #tpu.memory_space<vmem>>, vector<16x784xf32>
    %1 = arith.truncf %0 : vector<16x784xf32> to vector<16x784xbf16>
    %c0_1 = arith.constant 0 : index
    %c0_2 = arith.constant 0 : index
    %2 = vector.load %arg2[%c0_1, %c0_2] : memref<784x32xbf16, #tpu.memory_space<vmem>>, vector<784x32xbf16>
    %cst = arith.constant dense<0.000000e+00> : vector<16x32xf32>
    %3 = tpu.matmul %1, %2, %cst {dimension_numbers = #tpu.dot_dimension_numbers<[1], [0], [0], [1], [0, 0, 1, 1], [], []>} : vector<16x784xbf16>, vector<784x32xbf16>, vector<16x32xf32> -> vector<16x32xf32>
    %c0_3 = arith.constant 0 : index
    %c0_4 = arith.constant 0 : index
    %4 = vector.load %arg3[%c0_3, %c0_4] : memref<1x32xf32, #tpu.memory_space<vmem>>, vector<1x32xf32>
    %5 = vector.broadcast %4 : vector<1x32xf32> to vector<16x32xf32>
    %6 = arith.addf %3, %5 : vector<16x32xf32>
    %cst_5 = arith.constant 0.000000e+00 : f32
    %7 = vector.broadcast %cst_5 : f32 to vector<16x32xf32>
    %8 = arith.maximumf %6, %7 : vector<16x32xf32>
    %9 = arith.truncf %8 : vector<16x32xf32> to vector<16x32xbf16>
    %c0_6 = arith.constant 0 : index
    %c0_7 = arith.constant 0 : index
    %10 = vector.load %arg4[%c0_6, %c0_7] : memref<32x32xbf16, #tpu.memory_space<vmem>>, vector<32x32xbf16>
    %cst_8 = arith.constant dense<0.000000e+00> : vector<16x32xf32>
    %11 = tpu.matmul %9, %10, %cst_8 {dimension_numbers = #tpu.dot_dimension_numbers<[1], [0], [0], [1], [0, 0, 1, 1], [], []>} : vector<16x32xbf16>, vector<32x32xbf16>, vector<16x32xf32> -> vector<16x32xf32>
    %c0_9 = arith.constant 0 : index
    %c0_10 = arith.constant 0 : index
    %12 = vector.load %arg5[%c0_9, %c0_10] : memref<1x32xf32, #tpu.memory_space<vmem>>, vector<1x32xf32>
    %13 = vector.broadcast %12 : vector<1x32xf32> to vector<16x32xf32>
    %14 = arith.addf %11, %13 : vector<16x32xf32>
    %cst_11 = arith.constant 0.000000e+00 : f32
    %15 = vector.broadcast %cst_11 : f32 to vector<16x32xf32>
    %16 = arith.maximumf %14, %15 : vector<16x32xf32>
    %17 = arith.truncf %16 : vector<16x32xf32> to vector<16x32xbf16>
    %c0_12 = arith.constant 0 : index
    %c0_13 = arith.constant 0 : index
    %18 = vector.load %arg6[%c0_12, %c0_13] : memref<32x32xbf16, #tpu.memory_space<vmem>>, vector<32x32xbf16>
    %cst_14 = arith.constant dense<0.000000e+00> : vector<16x32xf32>
    %19 = tpu.matmul %17, %18, %cst_14 {dimension_numbers = #tpu.dot_dimension_numbers<[1], [0], [0], [1], [0, 0, 1, 1], [], []>} : vector<16x32xbf16>, vector<32x32xbf16>, vector<16x32xf32> -> vector<16x32xf32>
    %c0_15 = arith.constant 0 : index
    %c0_16 = arith.constant 0 : index
    %20 = vector.load %arg7[%c0_15, %c0_16] : memref<1x32xf32, #tpu.memory_space<vmem>>, vector<1x32xf32>
    %21 = vector.broadcast %20 : vector<1x32xf32> to vector<16x32xf32>
    %22 = arith.addf %19, %21 : vector<16x32xf32>
    %cst_17 = arith.constant 0.000000e+00 : f32
    %23 = vector.broadcast %cst_17 : f32 to vector<16x32xf32>
    %24 = arith.maximumf %22, %23 : vector<16x32xf32>
    %25 = arith.truncf %24 : vector<16x32xf32> to vector<16x32xbf16>
    %c0_18 = arith.constant 0 : index
    %c0_19 = arith.constant 0 : index
    %26 = vector.load %arg8[%c0_18, %c0_19] : memref<32x128xbf16, #tpu.memory_space<vmem>>, vector<32x128xbf16>
    %cst_20 = arith.constant dense<0.000000e+00> : vector<16x128xf32>
    %27 = tpu.matmul %25, %26, %cst_20 {dimension_numbers = #tpu.dot_dimension_numbers<[1], [0], [0], [1], [0, 0, 1, 1], [], []>} : vector<16x32xbf16>, vector<32x128xbf16>, vector<16x128xf32> -> vector<16x128xf32>
    %c0_21 = arith.constant 0 : index
    %c0_22 = arith.constant 0 : index
    %28 = vector.load %arg9[%c0_21, %c0_22] : memref<1x128xf32, #tpu.memory_space<vmem>>, vector<1x128xf32>
    %29 = vector.broadcast %28 : vector<1x128xf32> to vector<16x128xf32>
    %30 = arith.addf %27, %29 : vector<16x128xf32>
    %cst_23 = arith.constant dense<0xFF800000> : vector<16xf32>
    %31 = vector.multi_reduction <maximumf>, %30, %cst_23 [1] : vector<16x128xf32> to vector<16xf32>
    %32 = vector.shape_cast %31 : vector<16xf32> to vector<16x1xf32>
    %33 = vector.broadcast %32 : vector<16x1xf32> to vector<16x128xf32>
    %34 = arith.subf %30, %33 : vector<16x128xf32>
    %35 = math.exp %34 : vector<16x128xf32>
    %cst_24 = arith.constant dense<0.000000e+00> : vector<16xf32>
    %36 = vector.multi_reduction <add>, %35, %cst_24 [1] : vector<16x128xf32> to vector<16xf32>
    %37 = vector.shape_cast %36 : vector<16xf32> to vector<16x1xf32>
    %38 = math.log %37 : vector<16x1xf32>
    %39 = vector.broadcast %38 : vector<16x1xf32> to vector<16x128xf32>
    %40 = arith.subf %34, %39 : vector<16x128xf32>
    %41 = arith.truncf %40 : vector<16x128xf32> to vector<16x128xbf16>
    %c0_25 = arith.constant 0 : index
    %c0_26 = arith.constant 0 : index
    %42 = vector.load %arg10[%c0_25, %c0_26] : memref<16x128xbf16, #tpu.memory_space<vmem>>, vector<16x128xbf16>
    tpu.vector_store %arg10[%c0_25, %c0_26], %41 {strides = array<i32>} : memref<16x128xbf16, #tpu.memory_space<vmem>>, vector<16x128xbf16>,
    return
  }
  func.func @transform_0(%arg0: i32) -> (i32, i32) {
    %c0_i32 = arith.constant 0 : i32
    %c0_i32_0 = arith.constant 0 : i32
    return %arg0, %c0_i32 : i32, i32
  }
  func.func @transform_1(%arg0: i32) -> (i32, i32) {
    %c0_i32 = arith.constant 0 : i32
    %c0_i32_0 = arith.constant 0 : i32
    %c0_i32_1 = arith.constant 0 : i32
    return %c0_i32, %c0_i32_0 : i32, i32
  }
  func.func @transform_2(%arg0: i32) -> (i32, i32) {
    %c0_i32 = arith.constant 0 : i32
    %c0_i32_0 = arith.constant 0 : i32
    %c0_i32_1 = arith.constant 0 : i32
    return %c0_i32, %c0_i32_0 : i32, i32
  }
  func.func @transform_3(%arg0: i32) -> (i32, i32) {
    %c0_i32 = arith.constant 0 : i32
    %c0_i32_0 = arith.constant 0 : i32
    %c0_i32_1 = arith.constant 0 : i32
    return %c0_i32, %c0_i32_0 : i32, i32
  }
  func.func @transform_4(%arg0: i32) -> (i32, i32) {
    %c0_i32 = arith.constant 0 : i32
    %c0_i32_0 = arith.constant 0 : i32
    %c0_i32_1 = arith.constant 0 : i32
    return %c0_i32, %c0_i32_0 : i32, i32
  }
  func.func @transform_5(%arg0: i32) -> (i32, i32) {
    %c0_i32 = arith.constant 0 : i32
    %c0_i32_0 = arith.constant 0 : i32
    %c0_i32_1 = arith.constant 0 : i32
    return %c0_i32, %c0_i32_0 : i32, i32
  }
  func.func @transform_6(%arg0: i32) -> (i32, i32) {
    %c0_i32 = arith.constant 0 : i32
    %c0_i32_0 = arith.constant 0 : i32
    %c0_i32_1 = arith.constant 0 : i32
    return %c0_i32, %c0_i32_0 : i32, i32
  }
  func.func @transform_7(%arg0: i32) -> (i32, i32) {
    %c0_i32 = arith.constant 0 : i32
    %c0_i32_0 = arith.constant 0 : i32
    %c0_i32_1 = arith.constant 0 : i32
    return %c0_i32, %c0_i32_0 : i32, i32
  }
  func.func @transform_8(%arg0: i32) -> (i32, i32) {
    %c0_i32 = arith.constant 0 : i32
    %c0_i32_0 = arith.constant 0 : i32
    %c0_i32_1 = arith.constant 0 : i32
    return %c0_i32, %c0_i32_0 : i32, i32
  }
  func.func @transform_9(%arg0: i32) -> (i32, i32) {
    %c0_i32 = arith.constant 0 : i32
    %c0_i32_0 = arith.constant 0 : i32
    return %arg0, %c0_i32 : i32, i32
  }
}

</mosaic_0001>

<bundles_post_ra>
// kernel: tpu_custom_call.1
= control target key start
LH: loop header
LB: loop body
LE: loop exit
PB: predicated region body
PF: predicated region fallthrough
CT: control target
= control target key end

     0   :  { %v1150_v43 = vmov 0.0   ;;  %vm1151_vm0 = vmmov 0   ;;  %vm454_vm1 = vcmask 130048   ;;  %s1454_s0 = inlined_call_operand.vmem [shape: f32[16,784], index: 0, kind: input, shape index: {}]   ;;  %s1455_s1 = inlined_call_operand.vmem [shape: bf16[784,32], index: 1, kind: input, shape index: {}]   ;;  %s1456_s2 = inlined_call_operand.vmem [shape: f32[1,32], index: 2, kind: input, shape index: {}]   ;;  %s1457_s3 = inlined_call_operand.vmem [shape: bf16[32,32], index: 3, kind: input, shape index: {}]   ;;  %s1458_s4 = inlined_call_operand.vmem [shape: f32[1,32], index: 4, kind: input, shape index: {}]   ;;  %s1459_s5 = inlined_call_operand.vmem [shape: bf16[32,32], index: 5, kind: input, shape index: {}]   ;;  %s1460_s6 = inlined_call_operand.vmem [shape: f32[1,32], index: 6, kind: input, shape index: {}]   ;;  %s1461_s7 = inlined_call_operand.vmem [shape: bf16[32,128], index: 7, kind: input, shape index: {}]   ;;  %s1462_s8 = inlined_call_operand.vmem [shape: f32[1,128], index: 8, kind: input, shape index: {}]   ;;  %s1463_s9 = inlined_call_operand.hbm [shape: bf16[16,128], index: 9, kind: output, shape index: {}]  }
   0x1   :  { %v1063_v0 = vld [vmem:[%s1455_s1 + $0x40] sm:$0xff]   ;;  %v1067_v4 = vld [vmem:[%s1455_s1 + $0x48] sm:$0xff]   ;;  %v1071_v8 = vld [vmem:[%s1455_s1 + $0x50] sm:$0xff]  }
   0x2   :  { %v1064_v1 = vld [vmem:[%s1455_s1] sm:$0xff]   ;;  %951 = vmatprep.subr.bf16.mxu0 %v1063_v0  ;;  %v1068_v5 = vld [vmem:[%s1455_s1 + $0x8] sm:$0xff]   ;;  %v1072_v9 = vld [vmem:[%s1455_s1 + $0x10] sm:$0xff]  }
   0x3   :  { %v1065_v2 = vld [vmem:[%s1455_s1 + $0xc0] sm:$0xff]   ;;  %952 = vmatpush3.bf16.msra.mxu0 %v1064_v1  ;;  %v1069_v6 = vld [vmem:[%s1455_s1 + $0xc8] sm:$0xff]   ;;  %v1073_v10 = vld [vmem:[%s1455_s1 + $0xd0] sm:$0xff]  }
   0x4   :  { %v1066_v3 = vld [vmem:[%s1455_s1 + $0x80] sm:$0xff]   ;;  %973 = vmatprep.subr.bf16.mxu1 %v1065_v2  ;;  %953 = vmatprep.subr.bf16.mxu0 %v1067_v4  ;;  %v1070_v7 = vld [vmem:[%s1455_s1 + $0x88] sm:$0xff]   ;;  %v1074_v11 = vld [vmem:[%s1455_s1 + $0x90] sm:$0xff]  }
   0x5   :  { %974 = vmatpush3.bf16.msra.mxu1 %v1066_v3  ;;  %v1075_v12 = vld [vmem:[%s1455_s1 + $0x58] sm:$0xff]   ;;  %v1079_v16 = vld [vmem:[%s1455_s1 + $0x60] sm:$0xff]   ;;  %v1083_v20 = vld [vmem:[%s1455_s1 + $0x68] sm:$0xff]  }
   0x6   :  { %975 = vmatprep.subr.bf16.mxu1 %v1069_v6  ;;  %v1076_v13 = vld [vmem:[%s1455_s1 + $0x18] sm:$0xff]   ;;  %v1080_v17 = vld [vmem:[%s1455_s1 + $0x20] sm:$0xff]   ;;  %v1084_v21 = vld [vmem:[%s1455_s1 + $0x28] sm:$0xff]  }
   0x7   :  { %954 = vmatpush3.bf16.msra.mxu0 %v1068_v5  ;;  %v1077_v14 = vld [vmem:[%s1455_s1 + $0xd8] sm:$0xff]   ;;  %v1081_v18 = vld [vmem:[%s1455_s1 + $0xe0] sm:$0xff]   ;;  %v1085_v22 = vld [vmem:[%s1455_s1 + $0xe8] sm:$0xff]  }
   0x8   :  { %955 = vmatprep.subr.bf16.mxu0 %v1071_v8  ;;  %v1078_v15 = vld [vmem:[%s1455_s1 + $0x98] sm:$0xff]   ;;  %v1082_v19 = vld [vmem:[%s1455_s1 + $0xa0] sm:$0xff]   ;;  %v1086_v23 = vld [vmem:[%s1455_s1 + $0xa8] sm:$0xff]  }
   0x9   :  { %976 = vmatpush3.bf16.msra.mxu1 %v1070_v7  ;;  %v1087_v24 = vld [vmem:[%s1455_s1 + $0x70] sm:$0xff]   ;;  %v1091_v28 = vld [vmem:[%s1455_s1 + $0x78] sm:$0xff]   ;;  %v35_v31 = vld [vmem:[%s1454_s0 + $0x8] sm:$0xff] }
   0xa   :  { %977 = vmatprep.subr.bf16.mxu1 %v1073_v10  ;;  %v1088_v25 = vld [vmem:[%s1455_s1 + $0x30] sm:$0xff]   ;;  %v1092_v29 = vld [vmem:[%s1455_s1 + $0x38] sm:$0xff]   ;;  %v42_v32 = vld [vmem:[%s1454_s0 + $0x40] sm:$0xff] }
   0xb   :  { %956 = vmatpush3.bf16.msra.mxu0 %v1072_v9  ;;  %v1089_v26 = vld [vmem:[%s1455_s1 + $0xf0] sm:$0xff]   ;;  %v1093_v30 = vld [vmem:[%s1455_s1 + $0xf8] sm:$0xff]   ;;  %v49_v33 = vpack.c.bf16 %v42_v32, %v35_v31  ;;  %v34_v35 = vld [vmem:[%s1454_s0] sm:$0xff] }
   0xc   :  { %957 = vmatprep.subr.bf16.mxu0 %v1075_v12  ;;  %v1090_v27 = vld [vmem:[%s1455_s1 + $0xb0] sm:$0xff]   ;;  %v1094_v34 = vld [vmem:[%s1455_s1 + $0xb8] sm:$0xff]   ;;  %v1095_v38 = vld [vmem:[%s1455_s1 + $0x140] sm:$0xff]  }
   0xd   :  { %978 = vmatpush3.bf16.msra.mxu1 %v1074_v11  ;;  %v41_v36 = vld [vmem:[%s1454_s0 + $0x38] sm:$0xff]  ;;  %490 = vmatprep.mubr.bf16.mxu0 %v49_v33  ;;  %v44_v40 = vld [vmem:[%s1454_s0 + $0x50] sm:$0xff]  ;;  %v1096_v42 = vld [vmem:[%s1455_s1 + $0x100] sm:$0xff]  }
   0xe   :  { %979 = vmatprep.subr.bf16.mxu1 %v1077_v14  ;;  %v48_v37 = vpack.c.bf16 %v41_v36, %v34_v35  ;;  %v37_v39 = vld [vmem:[%s1454_s0 + $0x18] sm:$0xff]  ;;  %v36_v44 = vld [vmem:[%s1454_s0 + $0x10] sm:$0xff]  ;;  %v43_v45 = vld [vmem:[%s1454_s0 + $0x48] sm:$0xff] }
   0xf   :  { %958 = vmatpush3.bf16.msra.mxu0 %v1076_v13  ;;  %v51_v41 = vpack.c.bf16 %v44_v40, %v37_v39  ;;  %v50_v46 = vpack.c.bf16 %v43_v45, %v36_v44  ;;  %v1097_v47 = vld [vmem:[%s1455_s1 + $0x148] sm:$0xff]   ;;  %v1099_v49 = vld [vmem:[%s1455_s1 + $0x150] sm:$0xff]   ;;  %v1101_v51 = vld [vmem:[%s1455_s1 + $0x158] sm:$0xff]  }
  0x10   :  { %959 = vmatprep.subr.bf16.mxu0 %v1079_v16  ;;  %v1098_v48 = vld [vmem:[%s1455_s1 + $0x108] sm:$0xff]   ;;  %v1100_v50 = vld [vmem:[%s1455_s1 + $0x110] sm:$0xff]   ;;  %v1102_v52 = vld [vmem:[%s1455_s1 + $0x118] sm:$0xff]  }
  0x11   :  { %980 = vmatpush3.bf16.msra.mxu1 %v1078_v15  ;;  %531 = vmatprep.mubr.bf16.mxu1 %v51_v41  ;;  %v1103_v53 = vld [vmem:[%s1455_s1 + $0x160] sm:$0xff]   ;;  %v1105_v55 = vld [vmem:[%s1455_s1 + $0x168] sm:$0xff]   ;;  %v1107_v59 = vld [vmem:[%s1455_s1 + $0x170] sm:$0xff]  }
  0x12   :  { %981 = vmatprep.subr.bf16.mxu1 %v1081_v18  ;;  %v1104_v54 = vld [vmem:[%s1455_s1 + $0x120] sm:$0xff]   ;;  %v39_v57 = vld [vmem:[%s1454_s0 + $0x28] sm:$0xff]  ;;  %v40_v62 = vld [vmem:[%s1454_s0 + $0x30] sm:$0xff] }
  0x13   :  { %960 = vmatpush3.bf16.msra.mxu0 %v1080_v17  ;;  %v1111_v56 = vld [vmem:[%s1455_s1 + $0x180] sm:$0xff]   ;;  %v1106_v58 = vld [vmem:[%s1455_s1 + $0x128] sm:$0xff]   ;;  %v1108_v1 = vld [vmem:[%s1455_s1 + $0x130] sm:$0xff]  }
  0x14   :  { %961 = vmatprep.subr.bf16.mxu0 %v1083_v20  ;;  %v46_v60 = vld [vmem:[%s1454_s0 + $0x60] sm:$0xff]  ;;  %v47_v63 = vld [vmem:[%s1454_s0 + $0x68] sm:$0xff] }
  0x15   :  { %982 = vmatpush3.bf16.msra.mxu1 %v1082_v19  ;;  %v53_v61 = vpack.c.bf16 %v46_v60, %v39_v57  ;;  %v54_v0 = vpack.c.bf16 %v47_v63, %v40_v62 }
  0x16   :  { %983 = vmatprep.subr.bf16.mxu1 %v1085_v22 }
  0x17   :  { %962 = vmatpush3.bf16.msra.mxu0 %v1084_v21 }
  0x18   :  { %963 = vmatprep.subr.bf16.mxu0 %v1087_v24 }
  0x19   :  { %984 = vmatpush3.bf16.msra.mxu1 %v1086_v23 }
  0x1a   :  { %985 = vmatprep.subr.bf16.mxu1 %v1089_v26 }
  0x1b   :  { %964 = vmatpush3.bf16.msra.mxu0 %v1088_v25 }
  0x1c   :  { %965 = vmatprep.subr.bf16.mxu0 %v1091_v28 }
  0x1d   :  { %986 = vmatpush3.bf16.msra.mxu1 %v1090_v27 }
  0x1e   :  { %987 = vmatprep.subr.bf16.mxu1 %v1093_v30 }
  0x1f   :  { %966 = vmatpush3.bf16.msra.mxu0 %v1092_v29 }
  0x20   :  { %995 = vmatprep.subr.bf16.mxu0 %v1095_v38 }
  0x21   :  { %988 = vmatpush3.bf16.msra.mxu1 %v1094_v34 }
  0x22   :  { %1028 = vmatprep.subr.bf16.mxu1 %v1150_v43  ;;  %491 = vmatmul.mubr.bf16.vlgmr.msra.gmra.mrb[0].mxu0 %v48_v37 }
  0x23   :  { %996 = vmatpush3.bf16.msra.mxu0 %v1096_v42  ;;  %572 = vmatprep.mubr.bf16.mxu0 %v53_v61 }
  0x24   :  { %532 = vmatmul.mubr.bf16.vlgmr.msra.gmra.mrb[0].mxu1 %v50_v46  ;;  %997 = vmatprep.subr.bf16.mxu0 %v1097_v47 }
  0x25   :  { %1030 = vmatprep.mubr.msk.bf16.mxu1 %vm1151_vm0, %v1150_v43  ;;  %1029 = vmatpush3.bf16.msra.mxu1 %v1111_v56 }
  0x26   :  { %1034 = vmatprep.subr.bf16.mxu1 %v1150_v43 }
  0x27   :  { %998 = vmatpush3.bf16.msra.mxu0 %v1098_v48 }
  0x28   :  { %999 = vmatprep.subr.bf16.mxu0 %v1099_v49 }
  0x2b   :  { %1000 = vmatpush3.bf16.msra.mxu0 %v1100_v50 }
  0x2c   :  { %1001 = vmatprep.subr.bf16.mxu0 %v1101_v51  ;;  %1031 = vmatmul.mubr.msk.bf16.vlgmr.msra.gmra.mrb[4].mxu1 %vm454_vm1, %v54_v0 }
  0x2d   :  { %1038 = vmatprep.mubr.msk.bf16.mxu1 %vm1151_vm0, %v1150_v43 }
  0x2f   :  { %1002 = vmatpush3.bf16.msra.mxu0 %v1102_v52 }
  0x30   :  { %1003 = vmatprep.subr.bf16.mxu0 %v1103_v53 }
  0x33   :  { %1004 = vmatpush3.bf16.msra.mxu0 %v1104_v54 }
  0x34   :  { %1005 = vmatprep.subr.bf16.mxu0 %v1105_v55 }
  0x37   :  { %1006 = vmatpush3.bf16.msra.mxu0 %v1106_v58 }
  0x38   :  { %14 = vsyncpa [#allocation3], 0  ;;  %1007 = vmatprep.subr.bf16.mxu0 %v1107_v59  ;;  %v1109_v2 = vld [vmem:[%s1455_s1 + $0x178] sm:$0xff]   ;;  %v38_v4 = vld [vmem:[%s1454_s0 + $0x20] sm:$0xff]  ;;  %vm648_vm2 = vcmask 261120  }
  0x39   :  { %v1110_v3 = vld [vmem:[%s1455_s1 + $0x138] sm:$0xff]   ;;  %v1112_v7 = vld [vmem:[%s1457_s3] sm:$0xff]   ;;  %v1113_v8 = vld [vmem:[%s1457_s3 + $0x8] sm:$0xff]  }
  0x3a   :  { %v45_v5 = vld [vmem:[%s1454_s0 + $0x58] sm:$0xff]  ;;  %1035 = vmatpush3.bf16.msra.mxu1 %v1112_v7  ;;  %v879_v10 = vld [vmem:[%s1456_s2] ss:$0 sm:$0xff]  ;;  %v1115_v45 = vld [vmem:[%s1459_s5 + $0x8] sm:$0xff]  }
  0x3b   :  { %1008 = vmatpush3.bf16.msra.mxu0 %v1108_v1  ;;  %v52_v6 = vpack.c.bf16 %v45_v5, %v38_v4  ;;  %1036 = vmatprep.subr.bf16.mxu1 %v1150_v43  ;;  %v1114_v44 = vld [vmem:[%s1459_s5] sm:$0xff]   ;;  %v1117_v57 = vld [vmem:[%s1461_s7 + $0x8] sm:$0xff]  }
  0x3c   :  { %1009 = vmatprep.subr.bf16.mxu0 %v1109_v2  ;;  %v930_v46 = vld [vmem:[%s1458_s4] ss:$0 sm:$0xff] }
  0x3d   :  { %v1116_v56 = vld [vmem:[%s1461_s7] sm:$0xff]  }
  0x3e   :  { %1037 = vmatpush3.bf16.msra.mxu1 %v1113_v8  ;;  %v934_v58 = vld [vmem:[%s1460_s6] ss:$0 sm:$0xff]  ;;  %s1152_s6 = smov [#allocation2]  }
  0x3f   :  { %1010 = vmatpush3.bf16.msra.mxu0 %v1110_v3  ;;  %1042 = vmatprep.subr.bf16.mxu1 %v1150_v43  ;;  %s868_s7 = sshll.u32 %s1152_s6, 4  ;;  %s869_s7 = int_to_ptr.vmem [resolvable:$true] %s868_s7 }
  0x40   :  { %p1131_p1 = scmp.lt.s32.totalorder %s869_s7, %s869_s7 }
  0x42   :  { %573 = vmatmul.mubr.bf16.vlgmr.msra.gmra.mrb[4].mxu0 %v52_v6 }
  0xf5   :  { %v967_v9 = vpop.f32.mrb[0].mxu0 }
  0xf6   :  { %v968_v11 = vpop.f32.mrb[1].mxu0 }
  0xf7   :  { %v969_v12 = vadd.f32 %v968_v11, %v967_v9  ;;  %v970_v13 = vpop.f32.mrb[2].mxu0  ;;  %v989_v14 = vpop.f32.mrb[0].mxu1 }
  0xf8   :  { %v971_v15 = vpop.f32.mrb[3].mxu0  ;;  %v990_v18 = vpop.f32.mrb[1].mxu1 }
  0xf9   :  { %v493_v16 = vadd.f32 %v969_v12, %v879_v10  ;;  %v972_v17 = vadd.f32 %v971_v15, %v970_v13  ;;  %v991_v19 = vadd.f32 %v990_v18, %v989_v14  ;;  %v992_v20 = vpop.f32.mrb[2].mxu1 }
  0xfa   :  { %v993_v22 = vpop.f32.mrb[3].mxu1 }
  0xfb   :  { %v496_v21 = vadd.f32 %v972_v17, %v879_v10  ;;  %v534_v23 = vadd.f32 %v991_v19, %v493_v16  ;;  %v994_v24 = vadd.f32 %v993_v22, %v992_v20 }
  0xfd   :  { %v537_v25 = vadd.f32 %v994_v24, %v496_v21 }
  0xff   :  { %v615_v26 = vpop.f32.mrb[4].mxu1 }
 0x100   :  { %v1032_v27 = vpop.f32.mrb[5].mxu1 }
 0x101   :  { %v618_v28 = vpop.f32.mrb[6].mxu1 }
 0x102   :  { %v1033_v29 = vpop.f32.mrb[7].mxu1 }
 0x115   :  { %v1011_v30 = vpop.f32.mrb[4].mxu0 }
 0x116   :  { %v1012_v31 = vpop.f32.mrb[5].mxu0 }
 0x117   :  { %v1013_v32 = vadd.f32 %v1012_v31, %v1011_v30  ;;  %v1014_v33 = vpop.f32.mrb[6].mxu0 }
 0x118   :  { %v1015_v34 = vpop.f32.mrb[7].mxu0 }
 0x119   :  { %v575_v35 = vadd.f32 %v1013_v32, %v534_v23  ;;  %v1016_v36 = vadd.f32 %v1015_v34, %v1014_v33 }
 0x11b   :  { %v616_v37 = vadd.f32 %v615_v26, %v575_v35  ;;  %v578_v38 = vadd.f32 %v1016_v36, %v537_v25 }
 0x11d   :  { %v619_v39 = vadd.f32 %v618_v28, %v578_v38  ;;  %v622_v40 = vmax.f32 %v616_v37, 0.0 }
 0x11f   :  { %v623_v41 = vmax.f32 %v619_v39, 0.0 }
 0x121   :  { %v624_v42 = vpack.c.bf16 %v623_v41, %v622_v40 }
 0x123   :  { %1039 = vmatmul.mubr.msk.bf16.vlgmr.msra.gmra.mrb[8].mxu1 %vm648_vm2, %v624_v42 }
 0x124   :  { %1046 = vmatprep.mubr.msk.bf16.mxu1 %vm1151_vm0, %v1150_v43  ;;  %1043 = vmatpush3.bf16.msra.mxu1 %v1114_v44 }
 0x125   :  { %1044 = vmatprep.subr.bf16.mxu1 %v1150_v43 }
 0x128   :  { %1045 = vmatpush3.bf16.msra.mxu1 %v1115_v45 }
 0x129   :  { %1050 = vmatprep.subr.bf16.mxu1 %v1150_v43 }
 0x1f6   :  { %v686_v47 = vpop.f32.mrb[8].mxu1 }
 0x1f7   :  { %v687_v48 = vadd.f32 %v930_v46, %v686_v47  ;;  %v1040_v49 = vpop.f32.mrb[9].mxu1 }
 0x1f8   :  { %v689_v50 = vpop.f32.mrb[10].mxu1 }
 0x1f9   :  { %v690_v51 = vadd.f32 %v930_v46, %v689_v50  ;;  %v1041_v52 = vpop.f32.mrb[11].mxu1  ;;  %v693_v53 = vmax.f32 %v687_v48, 0.0 }
 0x1fb   :  { %v694_v54 = vmax.f32 %v690_v51, 0.0 }
 0x1fd   :  { %v695_v55 = vpack.c.bf16 %v694_v54, %v693_v53 }
 0x1ff   :  { %1047 = vmatmul.mubr.msk.bf16.vlgmr.msra.gmra.mrb[12].mxu1 %vm648_vm2, %v695_v55 }
 0x200   :  { %1054 = vmatprep.mubr.msk.bf16.mxu1 %vm1151_vm0, %v1150_v43  ;;  %1051 = vmatpush3.bf16.msra.mxu1 %v1116_v56 }
 0x201   :  { %1052 = vmatprep.subr.bf16.mxu1 %v1150_v43  ;;  %v938_v43 = vld [vmem:[%s1462_s8] ss:$0 sm:$0xff]  ;;  %s1126_s8 = scalar_lea.vmem %s869_s7, 128 }
 0x202   :  { %p1127_p0 = scmp.ne.s32.totalorder %s869_s7, %s1126_s8  ;;  %p1132_p2 = scmp.lt.s32.totalorder %s1126_s8, %s1126_s8 }
 0x204   :  { %1053 = vmatpush3.bf16.msra.mxu1 %v1117_v57  ;;  %p1133_p3 = por %p1132_p2, %p1131_p1 }
 0x206   :  { %p1134_p4 = pnand %p1133_p3, %p1127_p0 }
 0x2d2   :  { %v756_v59 = vpop.f32.mrb[12].mxu1 }
 0x2d3   :  { %v757_v60 = vadd.f32 %v934_v58, %v756_v59  ;;  %v1048_v61 = vpop.f32.mrb[13].mxu1 }
 0x2d4   :  { %v759_v62 = vpop.f32.mrb[14].mxu1 }
 0x2d5   :  { %v760_v63 = vadd.f32 %v934_v58, %v759_v62  ;;  %v1049_v0 = vpop.f32.mrb[15].mxu1  ;;  %v763_v1 = vmax.f32 %v757_v60, 0.0 }
 0x2d7   :  { %v764_v2 = vmax.f32 %v760_v63, 0.0 }
 0x2d9   :  { %v765_v3 = vpack.c.bf16 %v764_v2, %v763_v1 }
 0x2db   :  { %1055 = vmatmul.mubr.msk.bf16.vlgmr.msra.gmra.mrb[16].mxu1 %vm648_vm2, %v765_v3 }
 0x3ae   :  { %v826_v4 = vpop.f32.mrb[16].mxu1 }
 0x3af   :  { %v827_v5 = vadd.f32 %v938_v43, %v826_v4  ;;  %v1056_v6 = vpop.f32.mrb[17].mxu1 }
 0x3b0   :  { %v829_v7 = vpop.f32.mrb[18].mxu1 }
 0x3b1   :  { %833 = vmax.xlane.f32.xlu0 %v827_v5  ;;  %v1057_v8 = vpop.f32.mrb[19].mxu1  ;;  %v830_v9 = vadd.f32 %v938_v43, %v829_v7 }
 0x3b5   :  { %835 = vmax.xlane.f32.xlu0 %v830_v9 }
 0x43e   :  { %v834_v10 = vpop.xlane.xlu0 %833 }
 0x43f   :  { %v837_v11 = vsub.f32 %v827_v5, %v834_v10 }
 0x441   :  { %v839_v12 = vmul.f32 1.442695, %v837_v11 }
 0x442   :  { %v836_v13 = vpop.xlane.xlu0 %835 }
 0x443   :  { %v838_v14 = vsub.f32 %v830_v9, %v836_v13  ;;  %1118 = vpow2.f32 %v839_v12 }
 0x445   :  { %v841_v15 = vmul.f32 1.442695, %v838_v14 }
 0x447   :  { %1120 = vpow2.f32 %v841_v15 }
 0x44d   :  { %v1119_v16 = vpop.eup %1118 }
 0x44e   :  { %843 = vadd.xlane.f32.xlu1 %v1119_v16 }
 0x451   :  { %v1121_v17 = vpop.eup %1120 }
 0x452   :  { %845 = vadd.xlane.f32.xlu1 %v1121_v17 }
 0x4db   :  { %v844_v18 = vpop.xlane.xlu1 %843 }
 0x4dc   :  { %1122 = vlog2.f32 %v844_v18 }
 0x4df   :  { %v846_v19 = vpop.xlane.xlu1 %845 }
 0x4e0   :  { %1124 = vlog2.f32 %v846_v19 }
 0x4e6   :  { %v1123_v20 = vpop.eup %1122 }
 0x4e7   :  { %v848_v21 = vmul.f32 0.6931472, %v1123_v20 }
 0x4e9   :  { %v851_v24 = vsub.f32 %v837_v11, %v848_v21 }
 0x4ea   :  { %v1125_v22 = vpop.eup %1124 }
 0x4eb   :  { %v850_v23 = vmul.f32 0.6931472, %v1125_v22 }
 0x4ed   :  { %v852_v25 = vsub.f32 %v838_v14, %v850_v23 }
 0x4ef   :  { %v949_v26 = vpack.c.bf16 %v852_v25, %v851_v24 }
 0x4f1   :  { %950 = vst [vmem:[#allocation2] sm:$0xff] %v949_v26  }
 0x4f2   :  { %1137 = shalt.err (!%p1134_p4)
}
 0x4f3   :  { %s1138_s25 = scalar_lea.hbm %s1463_s9, 128 }
 0x4f4   :  { %p1139_p5 = scmp.ne.s32.totalorder %s1463_s9, %s1138_s25  ;;  %p1142_p6 = scmp.lt.u32.totalorder %s1138_s25, %s1463_s9 }
 0x4f6   :  { %p1144_p7 = pnand %p1142_p6, %p1139_p5 }
 0x4f8   :  { %1147 = shalt.err (!%p1144_p7)
}
 0x4f9   :  { %s1153_s30 = smov 64   ;;  %s1154_s10 = smov 4  }
 0x4fa   :  { %874 = dma.vmem_to_hbm [thread:$0]  %s869_s7, 128, %s1463_s9, [#allocation3], %s1153_s30, %s1153_s30, %s1154_s10  }
 0x4fb   :  { %1148 = dma.done.wait [#allocation3], 128  }
 0x4fc   :  { %1149 = vsyncadd [#allocation3], 4294967168 }
 0x4fd   :  { %878 = vsyncpa [#allocation3], 1 }

</bundles_post_ra>
